<compile_context>
chip_gen: v5e
topology: v5e:2x2
jax: 0.10.0
libtpu: 0.0.40
codegen_flags: <defaults>
</compile_context>

<pallas_src>
import functools

import jax
import jax.numpy as jnp
from jax.experimental import pallas as pl
from jax.experimental.pallas import tpu as pltpu


def _snn_kernel(x_ref, w1_ref, w2_ref, spk_out_ref, mem_out_ref, *,
                beta, num_steps, threshold, num_outputs, k_pack):
    bb = x_ref.shape[0]                 # batch rows in this grid block
    n_hidden = w1_ref.shape[1]
    n_pad = w2_ref.shape[1]             # lane-padded fc2 output width
    f32 = jnp.float32

    # fc1 is identical every step (x does not change) -> compute once.
    cur1 = jnp.dot(x_ref[...], w1_ref[...], preferred_element_type=f32)
    # Hoist the fc2 weight load out of the time loop (one set of vlds).
    w2 = w2_ref[...]

    mem1 = jnp.zeros((bb, n_hidden), f32)
    spk1 = jnp.zeros((bb, n_hidden), f32)
    mem2 = jnp.zeros((bb, n_pad), f32)
    spk2 = jnp.zeros((bb, n_pad), f32)

    pack_spk, pack_mem = [], []

    for t in range(num_steps):
        # ---- layer-1 Leaky LIF (subtract reset; reset mask == previous spike)
        rst1 = spk1 if threshold == 1.0 else spk1 * threshold
        mem1 = beta * mem1 + cur1 - rst1
        spk1 = (mem1 > threshold).astype(f32)

        # ---- fc2 for this step (MXU; co-issues with adjacent-step VPU work)
        cur2 = jnp.dot(spk1, w2, preferred_element_type=f32)

        # ---- layer-2 Leaky LIF
        rst2 = spk2 if threshold == 1.0 else spk2 * threshold
        mem2 = beta * mem2 + cur2 - rst2
        spk2 = (mem2 > threshold).astype(f32)

        if k_pack > 1:
            # Pack k_pack steps into one dense 128-lane row: unmasked stores
            # and 1/k_pack of the HBM write bytes vs lane padding.
            pack_spk.append(spk2[:, :num_outputs])
            pack_mem.append(mem2[:, :num_outputs])
            if (t + 1) % k_pack == 0:
                row = t // k_pack
                spk_out_ref[row] = jnp.concatenate(pack_spk, axis=-1)
                mem_out_ref[row] = jnp.concatenate(pack_mem, axis=-1)
                pack_spk, pack_mem = [], []
        else:
            # Fallback: lane-padded dense rows (wrapper slices the padding off).
            spk_out_ref[t] = spk2
            mem_out_ref[t] = mem2


def prepare_snn_params(w1, w2):
    """One-time weight prep (hoisted out of the per-call path).

    w1: [num_hidden, num_inputs]; w2: [num_outputs, num_hidden].
    Returns (w1_t [num_inputs, num_hidden], w2_t [num_hidden, n_pad], num_outputs).
    """
    num_hidden, _ = w1.shape
    num_outputs = w2.shape[0]
    n_pad = ((num_outputs + 127) // 128) * 128
    w1_t = jnp.asarray(w1, jnp.float32).T
    w2_t = jnp.zeros((num_hidden, n_pad), jnp.float32)
    w2_t = w2_t.at[:, :num_outputs].set(jnp.asarray(w2, jnp.float32).T)
    return w1_t, w2_t, num_outputs


def snn_forward(x, w1_t, w2_t, *, num_outputs, beta, num_steps,
                threshold=1.0, batch_block=None):
    """x: [B, num_inputs]; w1_t/w2_t from prepare_snn_params."""
    assert threshold > 0.0, "zero-padded output lanes rely on threshold > 0 to stay silent"
    B, num_inputs = x.shape
    num_hidden = w1_t.shape[1]
    n_pad = w2_t.shape[1]
    x = jnp.asarray(x, jnp.float32)

    # Time-step lane-packing factor for the outputs.
    k_pack = 1
    if num_outputs < 128 and 128 % num_outputs == 0:
        cand = 128 // num_outputs
        if num_steps % cand == 0:
            k_pack = cand
    if k_pack > 1:
        t_rows, n_lane = num_steps // k_pack, 128
    else:
        t_rows, n_lane = num_steps, n_pad

    # Batch blocking: prefer >=2 blocks (both v7x TCs; writeback overlap on
    # v5e/v6e).  Tiny batches fall back to a single block.
    if batch_block is None:
        if B >= 256 and B % 128 == 0:
            batch_block = 128
        elif B >= 16 and (B // 2) % 8 == 0 and B % (B // 2) == 0:
            batch_block = B // 2
        else:
            batch_block = B
    assert B % batch_block == 0 and batch_block % 8 == 0, \
        "batch block must be sublane-aligned and divide B"
    nb = B // batch_block

    kernel = functools.partial(
        _snn_kernel, beta=float(beta), num_steps=int(num_steps),
        threshold=float(threshold), num_outputs=int(num_outputs),
        k_pack=int(k_pack))

    spk_p, mem_p = pl.pallas_call(
        kernel,
        out_shape=(
            jax.ShapeDtypeStruct((t_rows, B, n_lane), jnp.float32),
            jax.ShapeDtypeStruct((t_rows, B, n_lane), jnp.float32),
        ),
        grid_spec=pltpu.PrefetchScalarGridSpec(
            num_scalar_prefetch=0,
            grid=(nb,),
            in_specs=[
                pl.BlockSpec((batch_block, num_inputs), lambda i: (i, 0)),
                # Constant-index weight blocks; at production H add
                # pipeline_mode=pl.Buffered(1) (or a one-shot manual DMA) to
                # drop the redundant double buffer under v7x's 64 MiB VMEM.
                pl.BlockSpec((num_inputs, num_hidden), lambda i: (0, 0)),
                pl.BlockSpec((num_hidden, n_pad), lambda i: (0, 0)),
            ],
            out_specs=[
                pl.BlockSpec((t_rows, batch_block, n_lane), lambda i: (0, i, 0)),
                pl.BlockSpec((t_rows, batch_block, n_lane), lambda i: (0, i, 0)),
            ],
        ),
        compiler_params=pltpu.CompilerParams(
            dimension_semantics=("parallel",)),
    )(x, w1_t, w2_t)

    if k_pack > 1:
        def unpack(a):
            a = a.reshape(t_rows, B, k_pack, num_outputs)
            return a.transpose(0, 2, 1, 3).reshape(num_steps, B, num_outputs)
        return unpack(spk_p), unpack(mem_p)
    return spk_p[..., :num_outputs], mem_p[..., :num_outputs]


def snn_forward_ref(x, w1, w2, *, beta, num_steps, threshold=1.0):
    """Pure-JAX reference mirroring snntorch Leaky semantics (f32 throughout)."""
    B = x.shape[0]
    mem1 = jnp.zeros((B, w1.shape[0]), jnp.float32)
    mem2 = jnp.zeros((B, w2.shape[0]), jnp.float32)
    spk_rec, mem_rec = [], []
    cur1 = x @ w1.T
    for _ in range(num_steps):
        rst1 = (mem1 > threshold).astype(jnp.float32)
        mem1 = beta * mem1 + cur1 - rst1 * threshold
        spk1 = (mem1 > threshold).astype(jnp.float32)
        cur2 = spk1 @ w2.T
        rst2 = (mem2 > threshold).astype(jnp.float32)
        mem2 = beta * mem2 + cur2 - rst2 * threshold
        spk2 = (mem2 > threshold).astype(jnp.float32)
        spk_rec.append(spk2)
        mem_rec.append(mem2)
    return jnp.stack(spk_rec, 0), jnp.stack(mem_rec, 0)


if __name__ == "__main__":
    # Small but TPU-friendly shapes.
    B, num_inputs, num_hidden, num_outputs = 8, 64, 128, 16
    num_steps, beta = 8, 0.9

    key = jax.random.PRNGKey(0)
    kx, k1, k2 = jax.random.split(key, 3)
    x = jax.random.normal(kx, (B, num_inputs), jnp.float32)
    # Deterministic init mimicking nn.Linear default U(-1/sqrt(fan_in), 1/sqrt(fan_in)).
    w1 = jax.random.uniform(k1, (num_hidden, num_inputs), jnp.float32,
                            -1.0 / (num_inputs ** 0.5), 1.0 / (num_inputs ** 0.5))
    w2 = jax.random.uniform(k2, (num_outputs, num_hidden), jnp.float32,
                            -1.0 / (num_hidden ** 0.5), 1.0 / (num_hidden ** 0.5))

    # Weight prep done once (not per forward call).
    w1_t, w2_t, n_out = prepare_snn_params(w1, w2)

    spk_rec, mem_rec = snn_forward(x, w1_t, w2_t, num_outputs=n_out,
                                   beta=beta, num_steps=num_steps)
    jax.block_until_ready((spk_rec, mem_rec))

    spk_ref, mem_ref = snn_forward_ref(x, w1, w2, beta=beta, num_steps=num_steps)
    assert spk_rec.shape == (num_steps, B, num_outputs)
    assert mem_rec.shape == (num_steps, B, num_outputs)
    assert jnp.allclose(spk_rec, spk_ref, atol=1e-5), "spike mismatch"
    assert jnp.allclose(mem_rec, mem_ref, atol=1e-4), "membrane mismatch"

    print("KERNEL_OK")
</pallas_src>

<mosaic_0001>
module attributes {stable_mosaic.version = 11 : i64} {
  func.func @_snn_kernel(%arg0: i32, %arg1: memref<8x64xf32, #tpu.memory_space<vmem>>, %arg2: memref<64x128xf32, #tpu.memory_space<vmem>>, %arg3: memref<128x128xf32, #tpu.memory_space<vmem>>, %arg4: memref<1x8x128xf32, #tpu.memory_space<vmem>>, %arg5: memref<1x8x128xf32, #tpu.memory_space<vmem>>) attributes {dimension_semantics = [#tpu.dimension_semantics<parallel>], iteration_bounds = array<i64: 1>, scalar_prefetch = 0 : i64, scratch_operands = 0 : i64, tpu.core_type = #tpu.core_type<tc>, window_params = [{transform_indices = @transform_0, window_bounds = array<i64: 8, 64>}, {pipeline_mode = #tpu.pipeline_mode<synchronous>, transform_indices = @transform_1, window_bounds = array<i64: 64, 128>}, {pipeline_mode = #tpu.pipeline_mode<synchronous>, transform_indices = @transform_2, window_bounds = array<i64: 128, 128>}, {transform_indices = @transform_3, window_bounds = array<i64: 1, 8, 128>}, {transform_indices = @transform_4, window_bounds = array<i64: 1, 8, 128>}]} {
    %c0 = arith.constant 0 : index
    %c0_0 = arith.constant 0 : index
    %0 = vector.load %arg1[%c0, %c0_0] : memref<8x64xf32, #tpu.memory_space<vmem>>, vector<8x64xf32>
    %c0_1 = arith.constant 0 : index
    %c0_2 = arith.constant 0 : index
    %1 = vector.load %arg2[%c0_1, %c0_2] : memref<64x128xf32, #tpu.memory_space<vmem>>, vector<64x128xf32>
    %cst = arith.constant dense<0.000000e+00> : vector<8x128xf32>
    %2 = tpu.matmul %0, %1, %cst {dimension_numbers = #tpu.dot_dimension_numbers<[1], [0], [0], [1], [0, 0, 1, 1], [], []>} : vector<8x64xf32>, vector<64x128xf32>, vector<8x128xf32> -> vector<8x128xf32>
    %c0_3 = arith.constant 0 : index
    %c0_4 = arith.constant 0 : index
    %3 = vector.load %arg3[%c0_3, %c0_4] : memref<128x128xf32, #tpu.memory_space<vmem>>, vector<128x128xf32>
    %cst_5 = arith.constant 0.000000e+00 : f32
    %4 = vector.broadcast %cst_5 : f32 to vector<8x128xf32>
    %cst_6 = arith.constant 0.000000e+00 : f32
    %5 = vector.broadcast %cst_6 : f32 to vector<8x128xf32>
    %cst_7 = arith.constant 0.000000e+00 : f32
    %6 = vector.broadcast %cst_7 : f32 to vector<8x128xf32>
    %cst_8 = arith.constant 0.000000e+00 : f32
    %7 = vector.broadcast %cst_8 : f32 to vector<8x128xf32>
    %cst_9 = arith.constant 0.899999976 : f32
    %8 = vector.broadcast %cst_9 : f32 to vector<8x128xf32>
    %9 = arith.mulf %8, %4 : vector<8x128xf32>
    %10 = arith.addf %9, %2 : vector<8x128xf32>
    %11 = arith.subf %10, %5 : vector<8x128xf32>
    %cst_10 = arith.constant 1.000000e+00 : f32
    %12 = vector.broadcast %cst_10 : f32 to vector<8x128xf32>
    %13 = arith.cmpf ogt, %11, %12 : vector<8x128xf32>
    %14 = arith.extui %13 : vector<8x128xi1> to vector<8x128xi32>
    %15 = arith.sitofp %14 : vector<8x128xi32> to vector<8x128xf32>
    %cst_11 = arith.constant dense<0.000000e+00> : vector<8x128xf32>
    %16 = tpu.matmul %15, %3, %cst_11 {dimension_numbers = #tpu.dot_dimension_numbers<[1], [0], [0], [1], [0, 0, 1, 1], [], []>} : vector<8x128xf32>, vector<128x128xf32>, vector<8x128xf32> -> vector<8x128xf32>
    %cst_12 = arith.constant 0.899999976 : f32
    %17 = vector.broadcast %cst_12 : f32 to vector<8x128xf32>
    %18 = arith.mulf %17, %6 : vector<8x128xf32>
    %19 = arith.addf %18, %16 : vector<8x128xf32>
    %20 = arith.subf %19, %7 : vector<8x128xf32>
    %cst_13 = arith.constant 1.000000e+00 : f32
    %21 = vector.broadcast %cst_13 : f32 to vector<8x128xf32>
    %22 = arith.cmpf ogt, %20, %21 : vector<8x128xf32>
    %23 = arith.extui %22 : vector<8x128xi1> to vector<8x128xi32>
    %24 = arith.sitofp %23 : vector<8x128xi32> to vector<8x128xf32>
    %25 = vector.extract_strided_slice %24 {offsets = [0, 0], sizes = [8, 16], strides = [1, 1]} : vector<8x128xf32> to vector<8x16xf32>
    %26 = vector.extract_strided_slice %20 {offsets = [0, 0], sizes = [8, 16], strides = [1, 1]} : vector<8x128xf32> to vector<8x16xf32>
    %cst_14 = arith.constant 0.899999976 : f32
    %27 = vector.broadcast %cst_14 : f32 to vector<8x128xf32>
    %28 = arith.mulf %27, %11 : vector<8x128xf32>
    %29 = arith.addf %28, %2 : vector<8x128xf32>
    %30 = arith.subf %29, %15 : vector<8x128xf32>
    %cst_15 = arith.constant 1.000000e+00 : f32
    %31 = vector.broadcast %cst_15 : f32 to vector<8x128xf32>
    %32 = arith.cmpf ogt, %30, %31 : vector<8x128xf32>
    %33 = arith.extui %32 : vector<8x128xi1> to vector<8x128xi32>
    %34 = arith.sitofp %33 : vector<8x128xi32> to vector<8x128xf32>
    %cst_16 = arith.constant dense<0.000000e+00> : vector<8x128xf32>
    %35 = tpu.matmul %34, %3, %cst_16 {dimension_numbers = #tpu.dot_dimension_numbers<[1], [0], [0], [1], [0, 0, 1, 1], [], []>} : vector<8x128xf32>, vector<128x128xf32>, vector<8x128xf32> -> vector<8x128xf32>
    %cst_17 = arith.constant 0.899999976 : f32
    %36 = vector.broadcast %cst_17 : f32 to vector<8x128xf32>
    %37 = arith.mulf %36, %20 : vector<8x128xf32>
    %38 = arith.addf %37, %35 : vector<8x128xf32>
    %39 = arith.subf %38, %24 : vector<8x128xf32>
    %cst_18 = arith.constant 1.000000e+00 : f32
    %40 = vector.broadcast %cst_18 : f32 to vector<8x128xf32>
    %41 = arith.cmpf ogt, %39, %40 : vector<8x128xf32>
    %42 = arith.extui %41 : vector<8x128xi1> to vector<8x128xi32>
    %43 = arith.sitofp %42 : vector<8x128xi32> to vector<8x128xf32>
    %44 = vector.extract_strided_slice %43 {offsets = [0, 0], sizes = [8, 16], strides = [1, 1]} : vector<8x128xf32> to vector<8x16xf32>
    %45 = vector.extract_strided_slice %39 {offsets = [0, 0], sizes = [8, 16], strides = [1, 1]} : vector<8x128xf32> to vector<8x16xf32>
    %cst_19 = arith.constant 0.899999976 : f32
    %46 = vector.broadcast %cst_19 : f32 to vector<8x128xf32>
    %47 = arith.mulf %46, %30 : vector<8x128xf32>
    %48 = arith.addf %47, %2 : vector<8x128xf32>
    %49 = arith.subf %48, %34 : vector<8x128xf32>
    %cst_20 = arith.constant 1.000000e+00 : f32
    %50 = vector.broadcast %cst_20 : f32 to vector<8x128xf32>
    %51 = arith.cmpf ogt, %49, %50 : vector<8x128xf32>
    %52 = arith.extui %51 : vector<8x128xi1> to vector<8x128xi32>
    %53 = arith.sitofp %52 : vector<8x128xi32> to vector<8x128xf32>
    %cst_21 = arith.constant dense<0.000000e+00> : vector<8x128xf32>
    %54 = tpu.matmul %53, %3, %cst_21 {dimension_numbers = #tpu.dot_dimension_numbers<[1], [0], [0], [1], [0, 0, 1, 1], [], []>} : vector<8x128xf32>, vector<128x128xf32>, vector<8x128xf32> -> vector<8x128xf32>
    %cst_22 = arith.constant 0.899999976 : f32
    %55 = vector.broadcast %cst_22 : f32 to vector<8x128xf32>
    %56 = arith.mulf %55, %39 : vector<8x128xf32>
    %57 = arith.addf %56, %54 : vector<8x128xf32>
    %58 = arith.subf %57, %43 : vector<8x128xf32>
    %cst_23 = arith.constant 1.000000e+00 : f32
    %59 = vector.broadcast %cst_23 : f32 to vector<8x128xf32>
    %60 = arith.cmpf ogt, %58, %59 : vector<8x128xf32>
    %61 = arith.extui %60 : vector<8x128xi1> to vector<8x128xi32>
    %62 = arith.sitofp %61 : vector<8x128xi32> to vector<8x128xf32>
    %63 = vector.extract_strided_slice %62 {offsets = [0, 0], sizes = [8, 16], strides = [1, 1]} : vector<8x128xf32> to vector<8x16xf32>
    %64 = vector.extract_strided_slice %58 {offsets = [0, 0], sizes = [8, 16], strides = [1, 1]} : vector<8x128xf32> to vector<8x16xf32>
    %cst_24 = arith.constant 0.899999976 : f32
    %65 = vector.broadcast %cst_24 : f32 to vector<8x128xf32>
    %66 = arith.mulf %65, %49 : vector<8x128xf32>
    %67 = arith.addf %66, %2 : vector<8x128xf32>
    %68 = arith.subf %67, %53 : vector<8x128xf32>
    %cst_25 = arith.constant 1.000000e+00 : f32
    %69 = vector.broadcast %cst_25 : f32 to vector<8x128xf32>
    %70 = arith.cmpf ogt, %68, %69 : vector<8x128xf32>
    %71 = arith.extui %70 : vector<8x128xi1> to vector<8x128xi32>
    %72 = arith.sitofp %71 : vector<8x128xi32> to vector<8x128xf32>
    %cst_26 = arith.constant dense<0.000000e+00> : vector<8x128xf32>
    %73 = tpu.matmul %72, %3, %cst_26 {dimension_numbers = #tpu.dot_dimension_numbers<[1], [0], [0], [1], [0, 0, 1, 1], [], []>} : vector<8x128xf32>, vector<128x128xf32>, vector<8x128xf32> -> vector<8x128xf32>
    %cst_27 = arith.constant 0.899999976 : f32
    %74 = vector.broadcast %cst_27 : f32 to vector<8x128xf32>
    %75 = arith.mulf %74, %58 : vector<8x128xf32>
    %76 = arith.addf %75, %73 : vector<8x128xf32>
    %77 = arith.subf %76, %62 : vector<8x128xf32>
    %cst_28 = arith.constant 1.000000e+00 : f32
    %78 = vector.broadcast %cst_28 : f32 to vector<8x128xf32>
    %79 = arith.cmpf ogt, %77, %78 : vector<8x128xf32>
    %80 = arith.extui %79 : vector<8x128xi1> to vector<8x128xi32>
    %81 = arith.sitofp %80 : vector<8x128xi32> to vector<8x128xf32>
    %82 = vector.extract_strided_slice %81 {offsets = [0, 0], sizes = [8, 16], strides = [1, 1]} : vector<8x128xf32> to vector<8x16xf32>
    %83 = vector.extract_strided_slice %77 {offsets = [0, 0], sizes = [8, 16], strides = [1, 1]} : vector<8x128xf32> to vector<8x16xf32>
    %cst_29 = arith.constant 0.899999976 : f32
    %84 = vector.broadcast %cst_29 : f32 to vector<8x128xf32>
    %85 = arith.mulf %84, %68 : vector<8x128xf32>
    %86 = arith.addf %85, %2 : vector<8x128xf32>
    %87 = arith.subf %86, %72 : vector<8x128xf32>
    %cst_30 = arith.constant 1.000000e+00 : f32
    %88 = vector.broadcast %cst_30 : f32 to vector<8x128xf32>
    %89 = arith.cmpf ogt, %87, %88 : vector<8x128xf32>
    %90 = arith.extui %89 : vector<8x128xi1> to vector<8x128xi32>
    %91 = arith.sitofp %90 : vector<8x128xi32> to vector<8x128xf32>
    %cst_31 = arith.constant dense<0.000000e+00> : vector<8x128xf32>
    %92 = tpu.matmul %91, %3, %cst_31 {dimension_numbers = #tpu.dot_dimension_numbers<[1], [0], [0], [1], [0, 0, 1, 1], [], []>} : vector<8x128xf32>, vector<128x128xf32>, vector<8x128xf32> -> vector<8x128xf32>
    %cst_32 = arith.constant 0.899999976 : f32
    %93 = vector.broadcast %cst_32 : f32 to vector<8x128xf32>
    %94 = arith.mulf %93, %77 : vector<8x128xf32>
    %95 = arith.addf %94, %92 : vector<8x128xf32>
    %96 = arith.subf %95, %81 : vector<8x128xf32>
    %cst_33 = arith.constant 1.000000e+00 : f32
    %97 = vector.broadcast %cst_33 : f32 to vector<8x128xf32>
    %98 = arith.cmpf ogt, %96, %97 : vector<8x128xf32>
    %99 = arith.extui %98 : vector<8x128xi1> to vector<8x128xi32>
    %100 = arith.sitofp %99 : vector<8x128xi32> to vector<8x128xf32>
    %101 = vector.extract_strided_slice %100 {offsets = [0, 0], sizes = [8, 16], strides = [1, 1]} : vector<8x128xf32> to vector<8x16xf32>
    %102 = vector.extract_strided_slice %96 {offsets = [0, 0], sizes = [8, 16], strides = [1, 1]} : vector<8x128xf32> to vector<8x16xf32>
    %cst_34 = arith.constant 0.899999976 : f32
    %103 = vector.broadcast %cst_34 : f32 to vector<8x128xf32>
    %104 = arith.mulf %103, %87 : vector<8x128xf32>
    %105 = arith.addf %104, %2 : vector<8x128xf32>
    %106 = arith.subf %105, %91 : vector<8x128xf32>
    %cst_35 = arith.constant 1.000000e+00 : f32
    %107 = vector.broadcast %cst_35 : f32 to vector<8x128xf32>
    %108 = arith.cmpf ogt, %106, %107 : vector<8x128xf32>
    %109 = arith.extui %108 : vector<8x128xi1> to vector<8x128xi32>
    %110 = arith.sitofp %109 : vector<8x128xi32> to vector<8x128xf32>
    %cst_36 = arith.constant dense<0.000000e+00> : vector<8x128xf32>
    %111 = tpu.matmul %110, %3, %cst_36 {dimension_numbers = #tpu.dot_dimension_numbers<[1], [0], [0], [1], [0, 0, 1, 1], [], []>} : vector<8x128xf32>, vector<128x128xf32>, vector<8x128xf32> -> vector<8x128xf32>
    %cst_37 = arith.constant 0.899999976 : f32
    %112 = vector.broadcast %cst_37 : f32 to vector<8x128xf32>
    %113 = arith.mulf %112, %96 : vector<8x128xf32>
    %114 = arith.addf %113, %111 : vector<8x128xf32>
    %115 = arith.subf %114, %100 : vector<8x128xf32>
    %cst_38 = arith.constant 1.000000e+00 : f32
    %116 = vector.broadcast %cst_38 : f32 to vector<8x128xf32>
    %117 = arith.cmpf ogt, %115, %116 : vector<8x128xf32>
    %118 = arith.extui %117 : vector<8x128xi1> to vector<8x128xi32>
    %119 = arith.sitofp %118 : vector<8x128xi32> to vector<8x128xf32>
    %120 = vector.extract_strided_slice %119 {offsets = [0, 0], sizes = [8, 16], strides = [1, 1]} : vector<8x128xf32> to vector<8x16xf32>
    %121 = vector.extract_strided_slice %115 {offsets = [0, 0], sizes = [8, 16], strides = [1, 1]} : vector<8x128xf32> to vector<8x16xf32>
    %cst_39 = arith.constant 0.899999976 : f32
    %122 = vector.broadcast %cst_39 : f32 to vector<8x128xf32>
    %123 = arith.mulf %122, %106 : vector<8x128xf32>
    %124 = arith.addf %123, %2 : vector<8x128xf32>
    %125 = arith.subf %124, %110 : vector<8x128xf32>
    %cst_40 = arith.constant 1.000000e+00 : f32
    %126 = vector.broadcast %cst_40 : f32 to vector<8x128xf32>
    %127 = arith.cmpf ogt, %125, %126 : vector<8x128xf32>
    %128 = arith.extui %127 : vector<8x128xi1> to vector<8x128xi32>
    %129 = arith.sitofp %128 : vector<8x128xi32> to vector<8x128xf32>
    %cst_41 = arith.constant dense<0.000000e+00> : vector<8x128xf32>
    %130 = tpu.matmul %129, %3, %cst_41 {dimension_numbers = #tpu.dot_dimension_numbers<[1], [0], [0], [1], [0, 0, 1, 1], [], []>} : vector<8x128xf32>, vector<128x128xf32>, vector<8x128xf32> -> vector<8x128xf32>
    %cst_42 = arith.constant 0.899999976 : f32
    %131 = vector.broadcast %cst_42 : f32 to vector<8x128xf32>
    %132 = arith.mulf %131, %115 : vector<8x128xf32>
    %133 = arith.addf %132, %130 : vector<8x128xf32>
    %134 = arith.subf %133, %119 : vector<8x128xf32>
    %cst_43 = arith.constant 1.000000e+00 : f32
    %135 = vector.broadcast %cst_43 : f32 to vector<8x128xf32>
    %136 = arith.cmpf ogt, %134, %135 : vector<8x128xf32>
    %137 = arith.extui %136 : vector<8x128xi1> to vector<8x128xi32>
    %138 = arith.sitofp %137 : vector<8x128xi32> to vector<8x128xf32>
    %139 = vector.extract_strided_slice %138 {offsets = [0, 0], sizes = [8, 16], strides = [1, 1]} : vector<8x128xf32> to vector<8x16xf32>
    %140 = vector.extract_strided_slice %134 {offsets = [0, 0], sizes = [8, 16], strides = [1, 1]} : vector<8x128xf32> to vector<8x16xf32>
    %cst_44 = arith.constant 0.899999976 : f32
    %141 = vector.broadcast %cst_44 : f32 to vector<8x128xf32>
    %142 = arith.mulf %141, %125 : vector<8x128xf32>
    %143 = arith.addf %142, %2 : vector<8x128xf32>
    %144 = arith.subf %143, %129 : vector<8x128xf32>
    %cst_45 = arith.constant 1.000000e+00 : f32
    %145 = vector.broadcast %cst_45 : f32 to vector<8x128xf32>
    %146 = arith.cmpf ogt, %144, %145 : vector<8x128xf32>
    %147 = arith.extui %146 : vector<8x128xi1> to vector<8x128xi32>
    %148 = arith.sitofp %147 : vector<8x128xi32> to vector<8x128xf32>
    %cst_46 = arith.constant dense<0.000000e+00> : vector<8x128xf32>
    %149 = tpu.matmul %148, %3, %cst_46 {dimension_numbers = #tpu.dot_dimension_numbers<[1], [0], [0], [1], [0, 0, 1, 1], [], []>} : vector<8x128xf32>, vector<128x128xf32>, vector<8x128xf32> -> vector<8x128xf32>
    %cst_47 = arith.constant 0.899999976 : f32
    %150 = vector.broadcast %cst_47 : f32 to vector<8x128xf32>
    %151 = arith.mulf %150, %134 : vector<8x128xf32>
    %152 = arith.addf %151, %149 : vector<8x128xf32>
    %153 = arith.subf %152, %138 : vector<8x128xf32>
    %cst_48 = arith.constant 1.000000e+00 : f32
    %154 = vector.broadcast %cst_48 : f32 to vector<8x128xf32>
    %155 = arith.cmpf ogt, %153, %154 : vector<8x128xf32>
    %156 = arith.extui %155 : vector<8x128xi1> to vector<8x128xi32>
    %157 = arith.sitofp %156 : vector<8x128xi32> to vector<8x128xf32>
    %158 = vector.extract_strided_slice %157 {offsets = [0, 0], sizes = [8, 16], strides = [1, 1]} : vector<8x128xf32> to vector<8x16xf32>
    %159 = vector.extract_strided_slice %153 {offsets = [0, 0], sizes = [8, 16], strides = [1, 1]} : vector<8x128xf32> to vector<8x16xf32>
    %160 = tpu.concatenate %25, %44, %63, %82, %101, %120, %139, %158 in 1 : vector<8x16xf32>, vector<8x16xf32>, vector<8x16xf32>, vector<8x16xf32>, vector<8x16xf32>, vector<8x16xf32>, vector<8x16xf32>, vector<8x16xf32> -> vector<8x128xf32>
    %c0_49 = arith.constant 0 : index
    %c0_50 = arith.constant 0 : index
    %c0_51 = arith.constant 0 : index
    %161 = vector.load %arg4[%c0_49, %c0_50, %c0_51] : memref<1x8x128xf32, #tpu.memory_space<vmem>>, vector<1x8x128xf32>
    %162 = vector.shape_cast %161 : vector<1x8x128xf32> to vector<8x128xf32>
    %163 = vector.shape_cast %160 : vector<8x128xf32> to vector<1x8x128xf32>
    tpu.vector_store %arg4[%c0_49, %c0_50, %c0_51], %163 {strides = array<i32>} : memref<1x8x128xf32, #tpu.memory_space<vmem>>, vector<1x8x128xf32>,
    %164 = tpu.concatenate %26, %45, %64, %83, %102, %121, %140, %159 in 1 : vector<8x16xf32>, vector<8x16xf32>, vector<8x16xf32>, vector<8x16xf32>, vector<8x16xf32>, vector<8x16xf32>, vector<8x16xf32>, vector<8x16xf32> -> vector<8x128xf32>
    %c0_52 = arith.constant 0 : index
    %c0_53 = arith.constant 0 : index
    %c0_54 = arith.constant 0 : index
    %165 = vector.load %arg5[%c0_52, %c0_53, %c0_54] : memref<1x8x128xf32, #tpu.memory_space<vmem>>, vector<1x8x128xf32>
    %166 = vector.shape_cast %165 : vector<1x8x128xf32> to vector<8x128xf32>
    %167 = vector.shape_cast %164 : vector<8x128xf32> to vector<1x8x128xf32>
    tpu.vector_store %arg5[%c0_52, %c0_53, %c0_54], %167 {strides = array<i32>} : memref<1x8x128xf32, #tpu.memory_space<vmem>>, vector<1x8x128xf32>,
    return
  }
  func.func @transform_0(%arg0: i32) -> (i32, i32) {
    %c0_i32 = arith.constant 0 : i32
    %c0_i32_0 = arith.constant 0 : i32
    return %arg0, %c0_i32 : i32, i32
  }
  func.func @transform_1(%arg0: i32) -> (i32, i32) {
    %c0_i32 = arith.constant 0 : i32
    %c0_i32_0 = arith.constant 0 : i32
    %c0_i32_1 = arith.constant 0 : i32
    return %c0_i32, %c0_i32_0 : i32, i32
  }
  func.func @transform_2(%arg0: i32) -> (i32, i32) {
    %c0_i32 = arith.constant 0 : i32
    %c0_i32_0 = arith.constant 0 : i32
    %c0_i32_1 = arith.constant 0 : i32
    return %c0_i32, %c0_i32_0 : i32, i32
  }
  func.func @transform_3(%arg0: i32) -> (i32, i32, i32) {
    %c0_i32 = arith.constant 0 : i32
    %c0_i32_0 = arith.constant 0 : i32
    %c0_i32_1 = arith.constant 0 : i32
    return %c0_i32, %arg0, %c0_i32_0 : i32, i32, i32
  }
  func.func @transform_4(%arg0: i32) -> (i32, i32, i32) {
    %c0_i32 = arith.constant 0 : i32
    %c0_i32_0 = arith.constant 0 : i32
    %c0_i32_1 = arith.constant 0 : i32
    return %c0_i32, %arg0, %c0_i32_0 : i32, i32, i32
  }
}

</mosaic_0001>

<bundles_post_ra>
// kernel: tpu_custom_call.1
= control target key start
LH: loop header
LB: loop body
LE: loop exit
PB: predicated region body
PF: predicated region fallthrough
CT: control target
= control target key end

     0   :  { %10 = vsyncpa [#allocation3], 0  ;;  %s889_s0 = inlined_call_operand.hbm [shape: f32[8,64], index: 0, kind: input, shape index: {}]   ;;  %s890_s1 = inlined_call_operand.hbm [shape: f32[64,128], index: 1, kind: input, shape index: {}]   ;;  %s891_s2 = inlined_call_operand.hbm [shape: f32[128,128], index: 2, kind: input, shape index: {}]   ;;  %s892_s3 = inlined_call_operand.hbm [shape: f32[1,8,128], index: 3, kind: output, shape index: {0}]   ;;  %s893_s4 = inlined_call_operand.hbm [shape: f32[1,8,128], index: 4, kind: output, shape index: {1}]  }
   0x1   :  { %11 = vsyncpa [#allocation6], 0 }
   0x2   :  { %12 = vsyncpa [#allocation4], 0  ;;  %s29_s17 = sshll.u32 %s890_s1, 4  ;;  %s30_s17 = int_to_ptr.hbm [resolvable:$true] %s29_s17 }
   0x3   :  { %13 = vsyncpa [#allocation10], 0  ;;  %s644_s18 = smov [#allocation5]   ;;  %s19_s22 = sshll.u32 %s889_s0, 4  ;;  %s20_s22 = int_to_ptr.hbm [resolvable:$true] %s19_s22 }
   0x4   :  { %s31_s19 = sshll.u32 %s644_s18, 4  ;;  %s645_s23 = smov 128   ;;  %s32_s19 = int_to_ptr.vmem [resolvable:$true] %s31_s19 }
   0x5   :  { %s646_s24 = smov 8   ;;  %s647_s25 = smov [#allocation2]  }
   0x6   :  { %37 = dma.hbm_to_vmem [thread:$0]  %s30_s17, 1024, %s32_s19, [#allocation6], %s645_s23, %s645_s23, %s646_s24  }
   0x7   :  { %s21_s26 = sshll.u32 %s647_s25, 4  ;;  %s42_s29 = sshll.u32 %s891_s2, 4  ;;  %s22_s26 = int_to_ptr.vmem [resolvable:$true] %s21_s26  ;;  %s43_s29 = int_to_ptr.hbm [resolvable:$true] %s42_s29 }
   0x8   :  { %24 = dma.hbm_to_vmem [thread:$0]  %s20_s22, 128, %s22_s26, [#allocation3]  }
   0x9   :  { %s648_s1 = smov [#allocation7]  }
   0xa   :  { %s44_s30 = sshll.u32 %s648_s1, 4  ;;  %s45_s30 = int_to_ptr.vmem [resolvable:$true] %s44_s30 }
   0xb   :  { %50 = dma.hbm_to_vmem [thread:$0]  %s43_s29, 2048, %s45_s30, [#allocation6], %s645_s23, %s645_s23, %s646_s24  }
   0xc   :  { %636 = dma.done.wait [#allocation3], 128  }
   0xd   :  { %637 = vsyncadd [#allocation3], 4294967168 }
   0xe   :  { %638 = dma.done.wait [#allocation6], 3072  }
   0xf   :  { %639 = vsyncadd [#allocation6], 4294964224  ;;  %v71_v0 = vld [vmem:[#allocation5 + $0x38] sm:$0xff]  ;;  %v70_v1 = vld [vmem:[#allocation5 + $0x30] sm:$0xff]  ;;  %vm72_vm0 = vcmask 523264   ;;  %v649_v27 = vmov 1.0  }
  0x10   :  { %84 = vmatpush.msra.mxu0 %v71_v0  ;;  %v69_v2 = vld [vmem:[#allocation5 + $0x28] sm:$0xff]  ;;  %v694_v3 = vld [vmem:[#allocation7 + $0x78] sm:$0xff]  ;;  %v696_v4 = vld [vmem:[#allocation7 + $0x70] sm:$0xff]  ;;  %v650_v29 = vmov 0.0   ;;  %s651_s0 = smov 16   ;;  %s652_s2 = smov 32  }
  0x11   :  { %v68_v5 = vld [vmem:[#allocation5 + $0x20] sm:$0xff]  ;;  %116 = vmatpush.msra.mxu1 %v694_v3  ;;  %145 = vmatpush.msra.mxu2 %v694_v3  ;;  %v700_v6 = vld [vmem:[#allocation7 + $0x68] sm:$0xff]  ;;  %v67_v7 = vld [vmem:[#allocation5 + $0x18] sm:$0xff]  ;;  %s653_s5 = smov 48   ;;  %s654_s6 = smov 64  }
  0x12   :  { %85 = vmatpush.msra.mxu0 %v70_v1  ;;  %177 = vmatpush.msra.mxu3 %v694_v3  ;;  %v705_v8 = vld [vmem:[#allocation7 + $0x60] sm:$0xff]  ;;  %v66_v9 = vld [vmem:[#allocation5 + $0x10] sm:$0xff]  ;;  %v710_v10 = vld [vmem:[#allocation7 + $0x58] sm:$0xff]  ;;  %s655_s7 = smov 80   ;;  %s656_s8 = smov 96  }
  0x13   :  { %117 = vmatpush.msra.mxu1 %v696_v4  ;;  %146 = vmatpush.msra.mxu2 %v696_v4  ;;  %v65_v11 = vld [vmem:[#allocation5 + $0x8] sm:$0xff]  ;;  %v715_v12 = vld [vmem:[#allocation7 + $0x50] sm:$0xff]  ;;  %v64_v13 = vld [vmem:[#allocation5] sm:$0xff]  ;;  %s657_s9 = smov 112   ;;  %s658_s10 = smov [#allocation8]  }
  0x14   :  { %86 = vmatpush.msra.mxu0 %v69_v2  ;;  %178 = vmatpush.msra.mxu3 %v696_v4  ;;  %v63_v14 = vld [vmem:[#allocation2] sm:$0xff]  ;;  %v720_v15 = vld [vmem:[#allocation7 + $0x48] sm:$0xff]  ;;  %v725_v16 = vld [vmem:[#allocation7 + $0x40] sm:$0xff]  ;;  %s446_s11 = sshll.u32 %s658_s10, 4  ;;  %s448_s14 = sshll.u32 %s892_s3, 4  ;;  %s447_s11 = int_to_ptr.vmem [resolvable:$true] %s446_s11  ;;  %s449_s14 = int_to_ptr.hbm [resolvable:$true] %s448_s14 }
  0x15   :  { %118 = vmatpush.msra.mxu1 %v700_v6  ;;  %147 = vmatpush.msra.mxu2 %v700_v6  ;;  %v730_v17 = vld [vmem:[#allocation7 + $0x38] sm:$0xff]  ;;  %v736_v18 = vld [vmem:[#allocation7 + $0x30] sm:$0xff]  ;;  %v742_v19 = vld [vmem:[#allocation7 + $0x28] sm:$0xff]  ;;  %s659_s15 = smov [#allocation9]   ;;  %s459_s19 = sshll.u32 %s893_s4, 4  ;;  %s460_s19 = int_to_ptr.hbm [resolvable:$true] %s459_s19 }
  0x16   :  { %87 = vmatpush.msra.mxu0 %v68_v5  ;;  %179 = vmatpush.msra.mxu3 %v700_v6  ;;  %v748_v20 = vld [vmem:[#allocation7 + $0x20] sm:$0xff]  ;;  %v754_v21 = vld [vmem:[#allocation7 + $0x18] sm:$0xff]  ;;  %v760_v22 = vld [vmem:[#allocation7 + $0x10] sm:$0xff]  ;;  %s457_s16 = sshll.u32 %s659_s15, 4  ;;  %s458_s16 = int_to_ptr.vmem [resolvable:$true] %s457_s16 }
  0x17   :  { %119 = vmatpush.msra.mxu1 %v705_v8  ;;  %148 = vmatpush.msra.mxu2 %v705_v8  ;;  %v766_v23 = vld [vmem:[#allocation7 + $0x8] sm:$0xff]  ;;  %v772_v24 = vld [vmem:[#allocation7] sm:$0xff] }
  0x18   :  { %88 = vmatpush.msra.mxu0 %v67_v7  ;;  %180 = vmatpush.msra.mxu3 %v705_v8 }
  0x19   :  { %120 = vmatpush.msra.mxu1 %v710_v10  ;;  %149 = vmatpush.msra.mxu2 %v710_v10 }
  0x1a   :  { %89 = vmatpush.msra.mxu0 %v66_v9  ;;  %181 = vmatpush.msra.mxu3 %v710_v10 }
  0x1b   :  { %121 = vmatpush.msra.mxu1 %v715_v12  ;;  %150 = vmatpush.msra.mxu2 %v715_v12 }
  0x1c   :  { %90 = vmatpush.msra.mxu0 %v65_v11  ;;  %182 = vmatpush.msra.mxu3 %v715_v12 }
  0x1d   :  { %122 = vmatpush.msra.mxu1 %v720_v15  ;;  %151 = vmatpush.msra.mxu2 %v720_v15 }
  0x1e   :  { %91 = vmatpush.msra.mxu0 %v64_v13  ;;  %183 = vmatpush.msra.mxu3 %v720_v15 }
  0x1f   :  { %475 = vmatmul.msk.f32.vlgmr.msra.gmra.mxu0 %vm72_vm0, %v63_v14  ;;  %123 = vmatpush.msra.mxu1 %v725_v16 }
  0x20   :  { %209 = vmatpush.msrb.mxu0 %v694_v3  ;;  %152 = vmatpush.msra.mxu2 %v725_v16 }
  0x21   :  { %124 = vmatpush.msra.mxu1 %v730_v17  ;;  %184 = vmatpush.msra.mxu3 %v725_v16 }
  0x22   :  { %210 = vmatpush.msrb.mxu0 %v696_v4  ;;  %153 = vmatpush.msra.mxu2 %v730_v17 }
  0x23   :  { %125 = vmatpush.msra.mxu1 %v736_v18  ;;  %185 = vmatpush.msra.mxu3 %v730_v17 }
  0x24   :  { %211 = vmatpush.msrb.mxu0 %v700_v6  ;;  %154 = vmatpush.msra.mxu2 %v736_v18 }
  0x25   :  { %126 = vmatpush.msra.mxu1 %v742_v19  ;;  %186 = vmatpush.msra.mxu3 %v736_v18 }
  0x26   :  { %212 = vmatpush.msrb.mxu0 %v705_v8  ;;  %155 = vmatpush.msra.mxu2 %v742_v19 }
  0x27   :  { %127 = vmatpush.msra.mxu1 %v748_v20  ;;  %187 = vmatpush.msra.mxu3 %v742_v19 }
  0x28   :  { %213 = vmatpush.msrb.mxu0 %v710_v10  ;;  %156 = vmatpush.msra.mxu2 %v748_v20 }
  0x29   :  { %128 = vmatpush.msra.mxu1 %v754_v21  ;;  %188 = vmatpush.msra.mxu3 %v748_v20 }
  0x2a   :  { %214 = vmatpush.msrb.mxu0 %v715_v12  ;;  %157 = vmatpush.msra.mxu2 %v754_v21 }
  0x2b   :  { %129 = vmatpush.msra.mxu1 %v760_v22  ;;  %189 = vmatpush.msra.mxu3 %v754_v21 }
  0x2c   :  { %215 = vmatpush.msrb.mxu0 %v720_v15  ;;  %158 = vmatpush.msra.mxu2 %v760_v22 }
  0x2d   :  { %130 = vmatpush.msra.mxu1 %v766_v23  ;;  %190 = vmatpush.msra.mxu3 %v760_v22 }
  0x2e   :  { %216 = vmatpush.msrb.mxu0 %v725_v16  ;;  %159 = vmatpush.msra.mxu2 %v766_v23 }
  0x2f   :  { %131 = vmatpush.msra.mxu1 %v772_v24  ;;  %191 = vmatpush.msra.mxu3 %v766_v23 }
  0x30   :  { %217 = vmatpush.msrb.mxu0 %v730_v17  ;;  %160 = vmatpush.msra.mxu2 %v772_v24 }
  0x31   :  { %241 = vmatpush.msrb.mxu1 %v694_v3  ;;  %192 = vmatpush.msra.mxu3 %v772_v24 }
  0x32   :  { %218 = vmatpush.msrb.mxu0 %v736_v18  ;;  %273 = vmatpush.msrb.mxu2 %v694_v3 }
  0x33   :  { %242 = vmatpush.msrb.mxu1 %v696_v4  ;;  %305 = vmatpush.msrb.mxu3 %v694_v3 }
  0x34   :  { %219 = vmatpush.msrb.mxu0 %v742_v19  ;;  %274 = vmatpush.msrb.mxu2 %v696_v4 }
  0x35   :  { %243 = vmatpush.msrb.mxu1 %v700_v6  ;;  %306 = vmatpush.msrb.mxu3 %v696_v4 }
  0x36   :  { %220 = vmatpush.msrb.mxu0 %v748_v20  ;;  %275 = vmatpush.msrb.mxu2 %v700_v6 }
  0x37   :  { %244 = vmatpush.msrb.mxu1 %v705_v8  ;;  %307 = vmatpush.msrb.mxu3 %v700_v6 }
  0x38   :  { %221 = vmatpush.msrb.mxu0 %v754_v21  ;;  %276 = vmatpush.msrb.mxu2 %v705_v8 }
  0x39   :  { %245 = vmatpush.msrb.mxu1 %v710_v10  ;;  %308 = vmatpush.msrb.mxu3 %v705_v8 }
  0x3a   :  { %222 = vmatpush.msrb.mxu0 %v760_v22  ;;  %277 = vmatpush.msrb.mxu2 %v710_v10 }
  0x3b   :  { %246 = vmatpush.msrb.mxu1 %v715_v12  ;;  %309 = vmatpush.msrb.mxu3 %v710_v10 }
  0x3c   :  { %223 = vmatpush.msrb.mxu0 %v766_v23  ;;  %278 = vmatpush.msrb.mxu2 %v715_v12 }
  0x3d   :  { %247 = vmatpush.msrb.mxu1 %v720_v15  ;;  %310 = vmatpush.msrb.mxu3 %v715_v12 }
  0x3e   :  { %224 = vmatpush.msrb.mxu0 %v772_v24  ;;  %279 = vmatpush.msrb.mxu2 %v720_v15 }
  0x3f   :  { %248 = vmatpush.msrb.mxu1 %v725_v16  ;;  %311 = vmatpush.msrb.mxu3 %v720_v15 }
  0x40   :  { %337 = vmatpush.msra.mxu0 %v694_v3  ;;  %280 = vmatpush.msrb.mxu2 %v725_v16 }
  0x41   :  { %249 = vmatpush.msrb.mxu1 %v730_v17  ;;  %312 = vmatpush.msrb.mxu3 %v725_v16 }
  0x42   :  { %338 = vmatpush.msra.mxu0 %v696_v4  ;;  %281 = vmatpush.msrb.mxu2 %v730_v17 }
  0x43   :  { %250 = vmatpush.msrb.mxu1 %v736_v18  ;;  %313 = vmatpush.msrb.mxu3 %v730_v17 }
  0x44   :  { %339 = vmatpush.msra.mxu0 %v700_v6  ;;  %282 = vmatpush.msrb.mxu2 %v736_v18 }
  0x45   :  { %251 = vmatpush.msrb.mxu1 %v742_v19  ;;  %314 = vmatpush.msrb.mxu3 %v736_v18 }
  0x46   :  { %340 = vmatpush.msra.mxu0 %v705_v8  ;;  %283 = vmatpush.msrb.mxu2 %v742_v19 }
  0x47   :  { %252 = vmatpush.msrb.mxu1 %v748_v20  ;;  %315 = vmatpush.msrb.mxu3 %v742_v19 }
  0x48   :  { %341 = vmatpush.msra.mxu0 %v710_v10  ;;  %284 = vmatpush.msrb.mxu2 %v748_v20 }
  0x49   :  { %253 = vmatpush.msrb.mxu1 %v754_v21  ;;  %316 = vmatpush.msrb.mxu3 %v748_v20 }
  0x4a   :  { %342 = vmatpush.msra.mxu0 %v715_v12  ;;  %285 = vmatpush.msrb.mxu2 %v754_v21 }
  0x4b   :  { %254 = vmatpush.msrb.mxu1 %v760_v22  ;;  %317 = vmatpush.msrb.mxu3 %v754_v21 }
  0x4c   :  { %343 = vmatpush.msra.mxu0 %v720_v15  ;;  %286 = vmatpush.msrb.mxu2 %v760_v22 }
  0x4d   :  { %255 = vmatpush.msrb.mxu1 %v766_v23  ;;  %318 = vmatpush.msrb.mxu3 %v760_v22 }
  0x4e   :  { %344 = vmatpush.msra.mxu0 %v725_v16  ;;  %287 = vmatpush.msrb.mxu2 %v766_v23 }
  0x4f   :  { %256 = vmatpush.msrb.mxu1 %v772_v24  ;;  %319 = vmatpush.msrb.mxu3 %v766_v23 }
  0x50   :  { %345 = vmatpush.msra.mxu0 %v730_v17  ;;  %288 = vmatpush.msrb.mxu2 %v772_v24 }
  0x51   :  { %320 = vmatpush.msrb.mxu3 %v772_v24 }
  0x52   :  { %346 = vmatpush.msra.mxu0 %v736_v18 }
  0x54   :  { %347 = vmatpush.msra.mxu0 %v742_v19 }
  0x56   :  { %348 = vmatpush.msra.mxu0 %v748_v20 }
  0x58   :  { %349 = vmatpush.msra.mxu0 %v754_v21 }
  0x5a   :  { %350 = vmatpush.msra.mxu0 %v760_v22 }
  0x5c   :  { %351 = vmatpush.msra.mxu0 %v766_v23 }
  0x5e   :  { %352 = vmatpush.msra.mxu0 %v772_v24 }
  0x9c   :  { %v93_v25 = vpop.f32.mrf.mxu0 }
  0x9d   :  { %vm113_vm1 = vcmp.gt.f32.partialorder %v93_v25, 1.0  ;;  %v139_v26 = vmul.f32 0.9, %v93_v25 }
  0x9e   :  { %477 = vmatmul.msk.f32.vlgmr.msra.gmra.mxu1 %vm113_vm1, %v649_v27  ;;  %v476_v30 = vsel %vm113_vm1, 1.0, %v650_v29 }
  0x9f   :  { %v140_v28 = vadd.f32 %v139_v26, %v93_v25 }
  0xa1   :  { %v141_v31 = vsub.f32 %v140_v28, %v476_v30 }
  0xa3   :  { %vm142_vm2 = vcmp.gt.f32.partialorder %v141_v31, 1.0  ;;  %v171_v32 = vmul.f32 0.9, %v141_v31 }
  0xa4   :  { %480 = vmatmul.msk.f32.vlgmr.msra.gmra.mxu2 %vm142_vm2, %v649_v27  ;;  %v479_v34 = vsel %vm142_vm2, 1.0, %v650_v29  ;;  %vm391_vm2 = vcmask 130048  }
  0xa5   :  { %v172_v33 = vadd.f32 %v171_v32, %v93_v25 }
  0xa7   :  { %v173_v35 = vsub.f32 %v172_v33, %v479_v34 }
  0xa9   :  { %vm174_vm3 = vcmp.gt.f32.partialorder %v173_v35, 1.0  ;;  %v203_v36 = vmul.f32 0.9, %v173_v35 }
  0xaa   :  { %483 = vmatmul.msk.f32.vlgmr.msra.gmra.mxu3 %vm174_vm3, %v649_v27  ;;  %v482_v38 = vsel %vm174_vm3, 1.0, %v650_v29  ;;  %vm393_vm3 = vcmask 261120  }
  0xab   :  { %v204_v37 = vadd.f32 %v203_v36, %v93_v25 }
  0xad   :  { %v205_v39 = vsub.f32 %v204_v37, %v482_v38 }
  0xaf   :  { %v235_v40 = vmul.f32 0.9, %v205_v39  ;;  %vm206_vm4 = vcmp.gt.f32.partialorder %v205_v39, 1.0 }
  0xb0   :  { %486 = vmatmul.msk.f32.vlgmr.msrb.gmra.mxu0 %vm206_vm4, %v649_v27  ;;  %v485_v42 = vsel %vm206_vm4, 1.0, %v650_v29  ;;  %vm395_vm4 = vcmask 392192  }
  0xb1   :  { %v236_v41 = vadd.f32 %v235_v40, %v93_v25 }
  0xb3   :  { %v237_v43 = vsub.f32 %v236_v41, %v485_v42 }
  0xb5   :  { %vm238_vm5 = vcmp.gt.f32.partialorder %v237_v43, 1.0  ;;  %v267_v44 = vmul.f32 0.9, %v237_v43 }
  0xb6   :  { %489 = vmatmul.msk.f32.vlgmr.msrb.gmra.mxu1 %vm238_vm5, %v649_v27  ;;  %v488_v46 = vsel %vm238_vm5, 1.0, %v650_v29  ;;  %vm398_vm5 = vcmask 654336  }
  0xb7   :  { %v268_v45 = vadd.f32 %v267_v44, %v93_v25 }
  0xb9   :  { %v269_v47 = vsub.f32 %v268_v45, %v488_v46 }
  0xbb   :  { %vm270_vm6 = vcmp.gt.f32.partialorder %v269_v47, 1.0  ;;  %v299_v48 = vmul.f32 0.9, %v269_v47 }
  0xbc   :  { %492 = vmatmul.msk.f32.vlgmr.msrb.gmra.mxu2 %vm270_vm6, %v649_v27  ;;  %v491_v50 = vsel %vm270_vm6, 1.0, %v650_v29  ;;  %vm402_vm6 = vcmask 916480  }
  0xbd   :  { %v300_v49 = vadd.f32 %v299_v48, %v93_v25 }
  0xbf   :  { %v301_v51 = vsub.f32 %v300_v49, %v491_v50 }
  0xc1   :  { %vm302_vm7 = vcmp.gt.f32.partialorder %v301_v51, 1.0  ;;  %v331_v52 = vmul.f32 0.9, %v301_v51 }
  0xc2   :  { %495 = vmatmul.msk.f32.vlgmr.msrb.gmra.mxu3 %vm302_vm7, %v649_v27  ;;  %v494_v54 = vsel %vm302_vm7, 1.0, %v650_v29  ;;  %vm400_vm7 = vcmask 785408  }
  0xc3   :  { %v332_v53 = vadd.f32 %v331_v52, %v93_v25 }
  0xc5   :  { %v333_v55 = vsub.f32 %v332_v53, %v494_v54 }
  0xc7   :  { %vm334_vm8 = vcmp.gt.f32.partialorder %v333_v55, 1.0 }
  0xc8   :  { %498 = vmatmul.msk.f32.vlgmr.msra.gmra.mxu0 %vm334_vm8, %v649_v27 }
 0x11b   :  { %v862_v56 = vpop.f32.mrf.mxu1 }
 0x11c   :  { %vm136_vm9 = vcmp.gt.f32.partialorder %v862_v56, 1.0  ;;  %v165_v57 = vmul.f32 0.9, %v862_v56 }
 0x11d   :  { %v867_v60 = vsel %vm136_vm9, 1.0, %v650_v29 }
 0x127   :  { %v162_v58 = vpop.f32.mrf.mxu2 }
 0x128   :  { %v166_v59 = vadd.f32 %v165_v57, %v162_v58 }
 0x12a   :  { %v167_v61 = vsub.f32 %v166_v59, %v867_v60 }
 0x12c   :  { %406 = vrot.lane.b32.xlu0 %v167_v61, %s651_s0  ;;  %vm168_vm10 = vcmp.gt.f32.partialorder %v167_v61, 1.0  ;;  %v197_v62 = vmul.f32 0.9, %v167_v61 }
 0x12d   :  { %v194_v63 = vpop.f32.mrf.mxu3  ;;  %v481_v1 = vsel %vm168_vm10, 1.0, %v650_v29  ;;  %v226_v4 = vpop.f32.mrf.mxu0 }
 0x12e   :  { %v198_v0 = vadd.f32 %v197_v62, %v194_v63 }
 0x130   :  { %v199_v2 = vsub.f32 %v198_v0, %v481_v1 }
 0x132   :  { %vm200_vm11 = vcmp.gt.f32.partialorder %v199_v2, 1.0  ;;  %v229_v3 = vmul.f32 0.9, %v199_v2  ;;  %410 = vrot.lane.b32.xlu1 %v199_v2, %s652_s2 }
 0x133   :  { %v484_v6 = vsel %vm200_vm11, 1.0, %v650_v29  ;;  %v258_v9 = vpop.f32.mrf.mxu1 }
 0x134   :  { %v230_v5 = vadd.f32 %v229_v3, %v226_v4  ;;  %364 = vrot.lane.b32.xlu0 %v481_v1, %s651_s0 }
 0x136   :  { %v231_v7 = vsub.f32 %v230_v5, %v484_v6 }
 0x138   :  { %vm232_vm12 = vcmp.gt.f32.partialorder %v231_v7, 1.0  ;;  %v261_v8 = vmul.f32 0.9, %v231_v7  ;;  %414 = vrot.lane.b32.xlu2 %v231_v7, %s653_s5 }
 0x139   :  { %v487_v11 = vsel %vm232_vm12, 1.0, %v650_v29 }
 0x13a   :  { %v262_v10 = vadd.f32 %v261_v8, %v258_v9  ;;  %368 = vrot.lane.b32.xlu1 %v484_v6, %s652_s2 }
 0x13c   :  { %v263_v12 = vsub.f32 %v262_v10, %v487_v11 }
 0x13e   :  { %v293_v13 = vmul.f32 0.9, %v263_v12  ;;  %vm264_vm13 = vcmp.gt.f32.partialorder %v263_v12, 1.0 }
 0x13f   :  { %v290_v14 = vpop.f32.mrf.mxu2  ;;  %v490_v15 = vsel %vm264_vm13, 1.0, %v650_v29 }
 0x140   :  { %v294_v16 = vadd.f32 %v293_v13, %v290_v14  ;;  %372 = vrot.lane.b32.xlu2 %v487_v11, %s653_s5  ;;  %376 = vrot.lane.b32.xlu0 %v490_v15, %s654_s6 }
 0x142   :  { %v295_v17 = vsub.f32 %v294_v16, %v490_v15  ;;  %418 = vrot.lane.b32.xlu1 %v263_v12, %s654_s6 }
 0x144   :  { %vm296_vm14 = vcmp.gt.f32.partialorder %v295_v17, 1.0  ;;  %v325_v18 = vmul.f32 0.9, %v295_v17 }
 0x145   :  { %v322_v19 = vpop.f32.mrf.mxu3  ;;  %v493_v21 = vsel %vm296_vm14, 1.0, %v650_v29  ;;  %v354_v24 = vpop.f32.mrf.mxu0 }
 0x146   :  { %v326_v20 = vadd.f32 %v325_v18, %v322_v19 }
 0x148   :  { %v327_v22 = vsub.f32 %v326_v20, %v493_v21  ;;  %422 = vrot.lane.b32.xlu0 %v295_v17, %s655_s7  ;;  %380 = vrot.lane.b32.xlu2 %v493_v21, %s655_s7 }
 0x14a   :  { %v357_v23 = vmul.f32 0.9, %v327_v22  ;;  %vm328_vm15 = vcmp.gt.f32.partialorder %v327_v22, 1.0 }
 0x14b   :  { %v496_v25 = vsel %vm328_vm15, 1.0, %v650_v29 }
 0x14c   :  { %v358_v26 = vadd.f32 %v357_v23, %v354_v24  ;;  %384 = vrot.lane.b32.xlu1 %v496_v25, %s656_s8 }
 0x14e   :  { %v359_v27 = vsub.f32 %v358_v26, %v496_v25 }
 0x150   :  { %426 = vrot.lane.b32.xlu2 %v327_v22, %s656_s8  ;;  %vm360_vm1 = vcmp.gt.f32.partialorder %v359_v27, 1.0 }
 0x151   :  { %v499_v28 = vsel %vm360_vm1, 1.0, %v650_v29 }
 0x152   :  { %388 = vrot.lane.b32.xlu0 %v499_v28, %s657_s9 }
 0x154   :  { %430 = vrot.lane.b32.xlu1 %v359_v27, %s657_s9 }
 0x192   :  { %v415_v32 = vpop.permute.xlu2 %414 }
 0x19a   :  { %v373_v35 = vpop.permute.xlu2 %372 }
 0x19e   :  { %v407_v30 = vpop.permute.xlu0 %406 }
 0x19f   :  { %v433_v29 = vsel %vm391_vm2, %v862_v56, %v407_v30 }
 0x1a2   :  { %v381_v38 = vpop.permute.xlu2 %380 }
 0x1a4   :  { %v411_v31 = vpop.permute.xlu1 %410 }
 0x1a5   :  { %v434_v42 = vsel %vm393_vm3, %v433_v29, %v411_v31 }
 0x1a6   :  { %v365_v33 = vpop.permute.xlu0 %364  ;;  %v435_v46 = vsel %vm395_vm4, %v434_v42, %v415_v32 }
 0x1a7   :  { %v392_v39 = vsel %vm391_vm2, %v867_v60, %v365_v33 }
 0x1aa   :  { %v427_v52 = vpop.permute.xlu2 %426 }
 0x1ac   :  { %v369_v34 = vpop.permute.xlu1 %368 }
 0x1ad   :  { %v394_v40 = vsel %vm393_vm3, %v392_v39, %v369_v34 }
 0x1ae   :  { %v396_v44 = vsel %vm395_vm4, %v394_v40, %v373_v35 }
 0x1b2   :  { %v377_v36 = vpop.permute.xlu0 %376 }
 0x1b3   :  { %v397_v45 = vsel %vm72_vm0, %v396_v44, %v377_v36 }
 0x1b4   :  { %v419_v37 = vpop.permute.xlu1 %418  ;;  %v399_v49 = vsel %vm398_vm5, %v397_v45, %v381_v38 }
 0x1b5   :  { %v436_v47 = vsel %vm72_vm0, %v435_v46, %v419_v37 }
 0x1ba   :  { %v423_v41 = vpop.permute.xlu0 %422 }
 0x1bb   :  { %v437_v48 = vsel %vm398_vm5, %v436_v47, %v423_v41 }
 0x1bc   :  { %v438_v54 = vsel %vm400_vm7, %v437_v48, %v427_v52 }
 0x1be   :  { %v385_v43 = vpop.permute.xlu1 %384 }
 0x1bf   :  { %v401_v50 = vsel %vm400_vm7, %v399_v49, %v385_v43 }
 0x1c4   :  { %v389_v51 = vpop.permute.xlu0 %388 }
 0x1c5   :  { %v403_v53 = vsel %vm402_vm6, %v401_v50, %v389_v51 }
 0x1c6   :  { %404 = vst [vmem:[#allocation8] sm:$0xff] %v403_v53  ;;  %v431_v55 = vpop.permute.xlu1 %430 }
 0x1c7   :  { %v439_v56 = vsel %vm402_vm6, %v438_v54, %v431_v55  ;;  %451 = dma.vmem_to_hbm [thread:$0]  %s447_s11, 128, %s449_s14, [#allocation4]  }
 0x1c8   :  { %440 = vst [vmem:[#allocation9] sm:$0xff] %v439_v56 }
 0x1c9   :  { %462 = dma.vmem_to_hbm [thread:$0]  %s458_s16, 128, %s460_s19, [#allocation10]  }
 0x1ca   :  { %640 = dma.done.wait [#allocation4], 128  }
 0x1cb   :  { %641 = vsyncadd [#allocation4], 4294967168 }
 0x1cc   :  { %642 = dma.done.wait [#allocation10], 128  }
 0x1cd   :  { %643 = vsyncadd [#allocation10], 4294967168 }
 0x1ce   :  { %471 = vsyncpa [#allocation3], 1 }
 0x1cf   :  { %472 = vsyncpa [#allocation6], 1 }
 0x1d0   :  { %473 = vsyncpa [#allocation4], 1 }
 0x1d1   :  { %474 = vsyncpa [#allocation10], 1 }

</bundles_post_ra>
